<compile_context>
chip_gen: v7x
topology: tpu7x:2x2x1
jax: 0.10.0
libtpu: 0.0.40
codegen_flags: <defaults>
</compile_context>

<pallas_src>
import jax
import jax.numpy as jnp
from jax.experimental import pallas as pl
from jax.experimental.pallas import tpu as pltpu


def _round_up(x, m):
    return ((x + m - 1) // m) * m


def _neurogenetic_kernel(x_ref, w_ref, apop_ref, o_ref, acc_ref):
    """One (tm, tn) output tile; K (reduction) is the innermost grid axis."""
    k = pl.program_id(2)

    @pl.when(k == 0)
    def _init():
        acc_ref[...] = jnp.zeros_like(acc_ref)

    # x tile (tm, tk) contracted with weight tile (tn, tk) along their last dims
    # -> (tm, tn).  This is the in-kernel "W.T" (trans_b on the MXU); the wrapper
    # never materializes a transposed weight copy in HBM.
    acc_ref[...] += jax.lax.dot_general(
        x_ref[...], w_ref[...],
        dimension_numbers=(((1,), (1,)), ((), ())),
        preferred_element_type=jnp.float32,
    )

    @pl.when(k == pl.num_programs(2) - 1)
    def _finalize():
        # Row-wise connectivity scale, applied once per output tile.
        # apop block is keyed to the M (row) tile index, not the N tile index.
        conn = jax.nn.sigmoid(apop_ref[...].astype(jnp.float32))   # (tm, 1)
        o_ref[...] = (acc_ref[...] * conn).astype(o_ref.dtype)


def _row_scaled_matmul(x, w, apop_rows, *, compute_dtype=None):
    """out[r, c] = (x @ w.T)[r, c] * sigmoid(apop_rows[r]);  x:(M,K), w:(N,K)."""
    M, K = x.shape
    N = w.shape[0]
    out_dtype = x.dtype

    # Tile sizes: 256/512 caps (256-aligned for v6e/v7x MXU, multiples of 128 for
    # v5e), clamped to the (8, 128)-aligned extent for small problems.
    tm = min(256, _round_up(M, 8))
    tn = min(256, _round_up(N, 128))
    tk = min(512, _round_up(K, 128))

    Mp, Np, Kp = _round_up(M, tm), _round_up(N, tn), _round_up(K, tk)

    # Zero padding is exact for the matmul; padded rows/cols are sliced off below.
    x_p = jnp.pad(x, ((0, Mp - M), (0, Kp - K)))
    w_p = jnp.pad(w, ((0, Np - N), (0, Kp - K)))
    apop_p = jnp.pad(apop_rows, (0, Mp - M)).reshape(Mp, 1)

    if compute_dtype is not None:
        # Optional bf16 inputs (f32 accumulate) for v6e/v7x: halves W HBM traffic.
        x_p = x_p.astype(compute_dtype)
        w_p = w_p.astype(compute_dtype)

    grid = (Mp // tm, Np // tn, Kp // tk)

    out_p = pl.pallas_call(
        _neurogenetic_kernel,
        out_shape=jax.ShapeDtypeStruct((Mp, Np), out_dtype),
        grid=grid,
        in_specs=[
            pl.BlockSpec((tm, tk), lambda i, j, k: (i, k)),    # x
            pl.BlockSpec((tn, tk), lambda i, j, k: (j, k)),    # W, native (N, K)
            pl.BlockSpec((tm, 1), lambda i, j, k: (i, 0)),     # apop, row-keyed
        ],
        out_specs=pl.BlockSpec((tm, tn), lambda i, j, k: (i, j)),
        scratch_shapes=[pltpu.VMEM((tm, tn), jnp.float32)],
        compiler_params=pltpu.CompilerParams(
            dimension_semantics=("parallel", "parallel", "arbitrary"),
            vmem_limit_bytes=64 * 1024 * 1024,
        ),
    )(x_p, w_p, apop_p)

    return out_p[:M, :N]


def neurogenetic_forward(x, weights, apoptosis, *, compute_dtype=None):
    """Forward pass of NeurogeneticLayer.

    x: (B, I), weights: (O, I), apoptosis: (O,).
    Matches torch broadcasting of (B, O) * (O, 1):
      B == O -> (B, O);  B == 1 -> (O, O);  O == 1 -> (B, 1).
    """
    B, I = x.shape
    O = weights.shape[0]

    if B == O:
        x_rows, apop_rows = x, apoptosis
    elif B == 1:
        # torch: (1, O) * (O, 1) broadcasts to (O, O) -> replicate the single row.
        x_rows, apop_rows = jnp.broadcast_to(x, (O, I)), apoptosis
    elif O == 1:
        # torch: (B, 1) * (1, 1) -> (B, 1); every row scaled by sigmoid(apop[0]).
        x_rows, apop_rows = x, jnp.broadcast_to(apoptosis, (B,))
    else:
        raise ValueError(
            f"torch broadcast (B,O)*(O,1) is illegal for B={B}, O={O}")

    return _row_scaled_matmul(x_rows, weights, apop_rows,
                              compute_dtype=compute_dtype)


if __name__ == "__main__":
    # Small shapes consistent with the module's forward.  The primary legal
    # broadcast case requires batch == output_dim.
    input_dim, output_dim = 32, 8
    batch = output_dim  # 8

    key = jax.random.PRNGKey(0)
    kx, kw, kx1 = jax.random.split(key, 3)

    x = jax.random.normal(kx, (batch, input_dim), dtype=jnp.float32)
    # Parameter init mirroring __init__: weights ~ randn, apoptosis = zeros.
    weights = jax.random.normal(kw, (output_dim, input_dim), dtype=jnp.float32)
    apoptosis = jnp.zeros((output_dim,), dtype=jnp.float32)

    out = jax.block_until_ready(neurogenetic_forward(x, weights, apoptosis))
    ref = (x @ weights.T) * jax.nn.sigmoid(apoptosis)[:, None]
    assert out.shape == (batch, output_dim)
    assert jnp.allclose(out, ref, atol=1e-5, rtol=1e-5)

    # B == 1 broadcast quirk: torch (1, O) * (O, 1) -> (O, O).
    x1 = jax.random.normal(kx1, (1, input_dim), dtype=jnp.float32)
    apop1 = 0.1 * jnp.arange(output_dim, dtype=jnp.float32)
    out1 = jax.block_until_ready(neurogenetic_forward(x1, weights, apop1))
    ref1 = (x1 @ weights.T) * jax.nn.sigmoid(apop1)[:, None]
    assert out1.shape == (output_dim, output_dim)
    assert jnp.allclose(out1, ref1, atol=1e-5, rtol=1e-5)

    print("KERNEL_OK")
</pallas_src>

<mosaic_0001>
module attributes {stable_mosaic.version = 11 : i64} {
  func.func @_neurogenetic_kernel(%arg0: i32, %arg1: i32, %arg2: i32, %arg3: memref<8x128xf32, #tpu.memory_space<vmem>>, %arg4: memref<128x128xf32, #tpu.memory_space<vmem>>, %arg5: memref<8x1xf32, #tpu.memory_space<vmem>>, %arg6: memref<8x128xf32, #tpu.memory_space<vmem>>, %arg7: memref<8x128xf32, #tpu.memory_space<vmem>>) attributes {dimension_semantics = [#tpu.dimension_semantics<parallel>, #tpu.dimension_semantics<parallel>, #tpu.dimension_semantics<arbitrary>], iteration_bounds = array<i64: 1, 1, 1>, scalar_prefetch = 0 : i64, scratch_operands = 1 : i64, tpu.core_type = #tpu.core_type<tc>, window_params = [{transform_indices = @transform_0, window_bounds = array<i64: 8, 128>}, {transform_indices = @transform_1, window_bounds = array<i64: 128, 128>}, {transform_indices = @transform_2, window_bounds = array<i64: 8, 1>}, {transform_indices = @transform_3, window_bounds = array<i64: 8, 128>}]} {
    %c0_i32 = arith.constant 0 : i32
    %0 = arith.cmpi eq, %arg2, %c0_i32 : i32
    %1 = arith.extui %0 : i1 to i32
    %c0_i32_0 = arith.constant 0 : i32
    %2 = arith.cmpi ne, %1, %c0_i32_0 : i32
    scf.if %2 {
      %cst_10 = arith.constant 0.000000e+00 : f32
      %12 = vector.broadcast %cst_10 : f32 to vector<8x128xf32>
      %c0_11 = arith.constant 0 : index
      %c0_12 = arith.constant 0 : index
      %13 = vector.load %arg7[%c0_11, %c0_12] : memref<8x128xf32, #tpu.memory_space<vmem>>, vector<8x128xf32>
      tpu.vector_store %arg7[%c0_11, %c0_12], %12 {strides = array<i32>} : memref<8x128xf32, #tpu.memory_space<vmem>>, vector<8x128xf32>,
    } else {
    }
    %c0 = arith.constant 0 : index
    %c0_1 = arith.constant 0 : index
    %3 = vector.load %arg7[%c0, %c0_1] : memref<8x128xf32, #tpu.memory_space<vmem>>, vector<8x128xf32>
    %c0_2 = arith.constant 0 : index
    %c0_3 = arith.constant 0 : index
    %4 = vector.load %arg3[%c0_2, %c0_3] : memref<8x128xf32, #tpu.memory_space<vmem>>, vector<8x128xf32>
    %c0_4 = arith.constant 0 : index
    %c0_5 = arith.constant 0 : index
    %5 = vector.load %arg4[%c0_4, %c0_5] : memref<128x128xf32, #tpu.memory_space<vmem>>, vector<128x128xf32>
    %cst = arith.constant dense<0.000000e+00> : vector<8x128xf32>
    %6 = tpu.matmul %4, %5, %cst {dimension_numbers = #tpu.dot_dimension_numbers<[1], [1], [0], [0], [0, 0, 1, 0], [], []>} : vector<8x128xf32>, vector<128x128xf32>, vector<8x128xf32> -> vector<8x128xf32>
    %7 = arith.addf %3, %6 : vector<8x128xf32>
    %c0_6 = arith.constant 0 : index
    %c0_7 = arith.constant 0 : index
    %8 = vector.load %arg7[%c0_6, %c0_7] : memref<8x128xf32, #tpu.memory_space<vmem>>, vector<8x128xf32>
    tpu.vector_store %arg7[%c0_6, %c0_7], %7 {strides = array<i32>} : memref<8x128xf32, #tpu.memory_space<vmem>>, vector<8x128xf32>,
    %c0_i32_8 = arith.constant 0 : i32
    %9 = arith.cmpi eq, %arg2, %c0_i32_8 : i32
    %10 = arith.extui %9 : i1 to i32
    %c0_i32_9 = arith.constant 0 : i32
    %11 = arith.cmpi ne, %10, %c0_i32_9 : i32
    scf.if %11 {
      %c0_10 = arith.constant 0 : index
      %c0_11 = arith.constant 0 : index
      %12 = vector.load %arg5[%c0_10, %c0_11] : memref<8x1xf32, #tpu.memory_space<vmem>>, vector<8x1xf32>
      %13 = arith.negf %12 : vector<8x1xf32>
      %14 = math.exp %13 : vector<8x1xf32>
      %cst_12 = arith.constant 1.000000e+00 : f32
      %15 = vector.broadcast %cst_12 : f32 to vector<8x1xf32>
      %16 = arith.addf %15, %14 : vector<8x1xf32>
      %17 = arith.divf %15, %16 : vector<8x1xf32>
      %c0_13 = arith.constant 0 : index
      %c0_14 = arith.constant 0 : index
      %18 = vector.load %arg7[%c0_13, %c0_14] : memref<8x128xf32, #tpu.memory_space<vmem>>, vector<8x128xf32>
      %19 = vector.broadcast %17 : vector<8x1xf32> to vector<8x128xf32>
      %20 = arith.mulf %18, %19 : vector<8x128xf32>
      %c0_15 = arith.constant 0 : index
      %c0_16 = arith.constant 0 : index
      %21 = vector.load %arg6[%c0_15, %c0_16] : memref<8x128xf32, #tpu.memory_space<vmem>>, vector<8x128xf32>
      tpu.vector_store %arg6[%c0_15, %c0_16], %20 {strides = array<i32>} : memref<8x128xf32, #tpu.memory_space<vmem>>, vector<8x128xf32>,
    } else {
    }
    return
  }
  func.func @transform_0(%arg0: i32, %arg1: i32, %arg2: i32) -> (i32, i32) {
    %c0_i32 = arith.constant 0 : i32
    return %arg0, %arg2 : i32, i32
  }
  func.func @transform_1(%arg0: i32, %arg1: i32, %arg2: i32) -> (i32, i32) {
    %c0_i32 = arith.constant 0 : i32
    return %arg1, %arg2 : i32, i32
  }
  func.func @transform_2(%arg0: i32, %arg1: i32, %arg2: i32) -> (i32, i32) {
    %c0_i32 = arith.constant 0 : i32
    %c0_i32_0 = arith.constant 0 : i32
    return %arg0, %c0_i32 : i32, i32
  }
  func.func @transform_3(%arg0: i32, %arg1: i32, %arg2: i32) -> (i32, i32) {
    %c0_i32 = arith.constant 0 : i32
    return %arg0, %arg1 : i32, i32
  }
}

</mosaic_0001>

<bundles_post_ra>
// kernel: tpu_custom_call.1
= control target key start
LH: loop header
LB: loop body
LE: loop exit
PB: predicated region body
PF: predicated region fallthrough
CT: control target
= control target key end

     0   :  { %8 = vsyncpa [#allocation4], 0  ;;  %s445_s0 = inlined_call_operand.hbm [shape: f32[8,128], index: 0, kind: input, shape index: {}]   ;;  %s446_s1 = inlined_call_operand.hbm [shape: f32[128,128], index: 1, kind: input, shape index: {}]   ;;  %s447_s2 = inlined_call_operand.hbm [shape: f32[8,1], index: 2, kind: input, shape index: {}]   ;;  %s448_s3 = inlined_call_operand.hbm [shape: f32[8,128], index: 3, kind: output, shape index: {}]  }
   0x1   :  { %9 = vsyncpa [#allocation7], 0 }
   0x2   :  { %10 = vsyncpa [#allocation5], 0  ;;  %s367_s12 = smov [#allocation6]   ;;  %s273_s16 = scalar_lea.hbm %s446_s1, 2048 }
   0x3   :  { %s26_s13 = sshll.u32 %s367_s12, 4  ;;  %p274_p0 = scmp.ne.s32.totalorder %s446_s1, %s273_s16  ;;  %s27_s13 = int_to_ptr.vmem [resolvable:$true] %s26_s13 }
   0x4   :  { %p277_p1 = scmp.lt.u32.totalorder %s273_s16, %s446_s1 }
   0x6   :  { %p279_p2 = pnand %p277_p1, %p274_p0 }
   0x8   :  { %282 = shalt.err (!%p279_p2)
}
   0x9   :  { %s283_s21 = scalar_lea.vmem %s27_s13, 2048  ;;  %p288_p4 = scmp.lt.s32.totalorder %s27_s13, %s27_s13 }
   0xa   :  { %p284_p3 = scmp.ne.s32.totalorder %s27_s13, %s283_s21  ;;  %p289_p5 = scmp.lt.s32.totalorder %s283_s21, %s283_s21 }
   0xc   :  { %p290_p6 = por %p289_p5, %p288_p4 }
   0xe   :  { %p291_p7 = pnand %p290_p6, %p284_p3 }
  0x10   :  { %294 = shalt.err (!%p291_p7)
}
  0x11   :  { %s368_s22 = smov 128   ;;  %s369_s23 = smov 8  }
  0x12   :  { %32 = dma.hbm_to_vmem [thread:$0]  %s446_s1, 2048, %s27_s13, [#allocation7], %s368_s22, %s368_s22, %s369_s23  }
  0x13   :  { %s370_s26 = smov [#allocation3]   ;;  %s371_s28 = smov [#allocation8]  }
  0x14   :  { %s17_s27 = sshll.u32 %s370_s26, 4  ;;  %s39_s29 = sshll.u32 %s371_s28, 4  ;;  %s18_s27 = int_to_ptr.vmem [resolvable:$true] %s17_s27  ;;  %s40_s29 = int_to_ptr.vmem [resolvable:$true] %s39_s29 }
  0x15   :  { %s295_s5 = scalar_lea.hbm %s445_s0, 128 }
  0x16   :  { %p296_p8 = scmp.ne.s32.totalorder %s445_s0, %s295_s5  ;;  %p299_p9 = scmp.lt.u32.totalorder %s295_s5, %s445_s0 }
  0x18   :  { %p301_p10 = pnand %p299_p9, %p296_p8 }
  0x1a   :  { %304 = shalt.err (!%p301_p10)
}
  0x1b   :  { %s305_s1 = scalar_lea.vmem %s18_s27, 128  ;;  %p310_p12 = scmp.lt.s32.totalorder %s18_s27, %s18_s27 }
  0x1c   :  { %p306_p11 = scmp.ne.s32.totalorder %s18_s27, %s305_s1  ;;  %p311_p13 = scmp.lt.s32.totalorder %s305_s1, %s305_s1 }
  0x1e   :  { %p312_p0 = por %p311_p13, %p310_p12 }
  0x20   :  { %p313_p1 = pnand %p312_p0, %p306_p11 }
  0x22   :  { %316 = shalt.err (!%p313_p1)
}
  0x23   :  { %20 = dma.hbm_to_vmem [thread:$0]  %s445_s0, 128, %s18_s27, [#allocation4]  }
  0x24   :  { %s317_s14 = scalar_lea.hbm %s447_s2, 128 }
  0x25   :  { %p318_p2 = scmp.ne.s32.totalorder %s447_s2, %s317_s14  ;;  %p321_p3 = scmp.lt.u32.totalorder %s317_s14, %s447_s2 }
  0x27   :  { %p323_p4 = pnand %p321_p3, %p318_p2 }
  0x29   :  { %326 = shalt.err (!%p323_p4)
}
  0x2a   :  { %s327_s19 = scalar_lea.vmem %s40_s29, 128  ;;  %p332_p6 = scmp.lt.s32.totalorder %s40_s29, %s40_s29 }
  0x2b   :  { %p328_p5 = scmp.ne.s32.totalorder %s40_s29, %s327_s19  ;;  %p333_p7 = scmp.lt.s32.totalorder %s327_s19, %s327_s19 }
  0x2d   :  { %p334_p8 = por %p333_p7, %p332_p6 }
  0x2f   :  { %p335_p9 = pnand %p334_p8, %p328_p5 }
  0x31   :  { %338 = shalt.err (!%p335_p9)
}
  0x32   :  { %42 = dma.hbm_to_vmem [thread:$0]  %s447_s2, 128, %s40_s29, [#allocation7]  }
  0x33   :  { %361 = dma.done.wait [#allocation4], 128  }
  0x34   :  { %362 = vsyncadd [#allocation4], 4294967168 }
  0x35   :  { %363 = dma.done.wait [#allocation7], 2176  }
  0x36   :  { %364 = vsyncadd [#allocation7], 4294965120  ;;  %v372_v0 = vmov 0.0|0.0   ;;  %vm373_vm0 = vmmov 0   ;;  %v374_v1 = vmov 0.0   ;;  %v375_v2 = vmov 0  }
  0x37   :  { %234 = vmatprep.subr.bf16.mxu0 %v372_v0  ;;  %231 = vmatprep.mubr.msk.f32.mxu0 %vm373_vm0, %v374_v1  ;;  %v59_v3 = vld [vmem:[#allocation6] sm:$0xff]  ;;  %v60_v4 = vld [vmem:[#allocation6 + $0x8] sm:$0xff]  ;;  %v61_v6 = vld [vmem:[#allocation6 + $0x10] sm:$0xff]  ;;  %s376_s2 = smov [#allocation9]  }
  0x38   :  { %268 = vset.pattern.permute.xlu0 %v375_v2  ;;  %v235_v5 = vpack.c.bf16 %v60_v4, %v59_v3  ;;  %v62_v7 = vld [vmem:[#allocation6 + $0x18] sm:$0xff]  ;;  %v150_v8 = vld [vmem:[#allocation8] sm:$0xff]  ;;  %v64_v12 = vld [vmem:[#allocation6 + $0x28] sm:$0xff]  ;;  %s171_s21 = sshll.u32 %s376_s2, 4  ;;  %s172_s21 = int_to_ptr.vmem [resolvable:$true] %s171_s21 }
  0x39   :  { %v181_v9 = vmul.f32 -1.442695, %v150_v8  ;;  %v238_v10 = vpack.c.bf16 %v62_v7, %v61_v6  ;;  %v63_v11 = vld [vmem:[#allocation6 + $0x20] sm:$0xff]  ;;  %v65_v16 = vld [vmem:[#allocation6 + $0x30] sm:$0xff]  ;;  %v66_v17 = vld [vmem:[#allocation6 + $0x38] sm:$0xff]  ;;  %s339_s22 = scalar_lea.vmem %s172_s21, 128  ;;  %p344_p11 = scmp.lt.s32.totalorder %s172_s21, %s172_s21 }
  0x3a   :  { %236 = vmatpush3.bf16.xpose.msra.mxu0 %v235_v5  ;;  %v241_v13 = vpack.c.bf16 %v64_v12, %v63_v11  ;;  %v244_v18 = vpack.c.bf16 %v66_v17, %v65_v16  ;;  %v67_v19 = vld [vmem:[#allocation6 + $0x40] sm:$0xff]  ;;  %v68_v20 = vld [vmem:[#allocation6 + $0x48] sm:$0xff]  ;;  %v69_v23 = vld [vmem:[#allocation6 + $0x50] sm:$0xff]  ;;  %p340_p10 = scmp.ne.s32.totalorder %s172_s21, %s339_s22  ;;  %p345_p12 = scmp.lt.s32.totalorder %s339_s22, %s339_s22 }
  0x3b   :  { %237 = vmatprep.subr.bf16.mxu0 %v372_v0  ;;  %269 = vpow2.f32 %v181_v9  ;;  %v247_v22 = vpack.c.bf16 %v68_v20, %v67_v19  ;;  %v70_v24 = vld [vmem:[#allocation6 + $0x58] sm:$0xff]  ;;  %v71_v26 = vld [vmem:[#allocation6 + $0x60] sm:$0xff]  ;;  %v72_v27 = vld [vmem:[#allocation6 + $0x68] sm:$0xff] }
  0x3c   :  { %v250_v25 = vpack.c.bf16 %v70_v24, %v69_v23  ;;  %v253_v28 = vpack.c.bf16 %v72_v27, %v71_v26  ;;  %v73_v29 = vld [vmem:[#allocation6 + $0x70] sm:$0xff]  ;;  %v74_v30 = vld [vmem:[#allocation6 + $0x78] sm:$0xff]  ;;  %p346_p13 = por %p345_p12, %p344_p11 }
  0x3d   :  { %v256_v31 = vpack.c.bf16 %v74_v30, %v73_v29  ;;  %v58_v32 = vld [vmem:[#allocation3] sm:$0xff] }
  0x3e   :  { %p347_p0 = pnand %p346_p13, %p340_p10 }
  0x42   :  { %239 = vmatpush3.bf16.xpose.msra.mxu0 %v238_v10 }
  0x43   :  { %240 = vmatprep.subr.bf16.mxu0 %v372_v0 }
  0x45   :  { %v270_v14 = vpop.eup %269 }
  0x46   :  { %v154_v15 = vadd.f32 1.0, %v270_v14 }
  0x48   :  { %271 = vrcp.f32 %v154_v15 }
  0x4a   :  { %242 = vmatpush3.bf16.xpose.msra.mxu0 %v241_v13 }
  0x4b   :  { %243 = vmatprep.subr.bf16.mxu0 %v372_v0 }
  0x52   :  { %245 = vmatpush3.bf16.xpose.msra.mxu0 %v244_v18  ;;  %v272_v21 = vpop.eup %271 }
  0x53   :  { %246 = vmatprep.subr.bf16.mxu0 %v372_v0  ;;  %160 = vperm.xlu0 %268, %v272_v21  }
  0x5a   :  { %248 = vmatpush3.bf16.xpose.msra.mxu0 %v247_v22 }
  0x5b   :  { %249 = vmatprep.subr.bf16.mxu0 %v372_v0 }
  0x62   :  { %251 = vmatpush3.bf16.xpose.msra.mxu0 %v250_v25 }
  0x63   :  { %252 = vmatprep.subr.bf16.mxu0 %v372_v0 }
  0x6a   :  { %254 = vmatpush3.bf16.xpose.msra.mxu0 %v253_v28 }
  0x6b   :  { %255 = vmatprep.subr.bf16.mxu0 %v372_v0 }
  0x72   :  { %257 = vmatpush3.bf16.xpose.msra.mxu0 %v256_v31 }
  0x79   :  { %232 = vmatmul.mubr.f32.vlgmr.msra.gmra.mrb[0].mxu0 %v58_v32 }
  0xd2   :  { %v161_v33 = vpop.permute.xlu0 %160 }
 0x14c   :  { %v141_v34 = vpop.f32.mrb[0].mxu0 }
 0x14d   :  { %v163_v35 = vmul.f32 %v161_v33, %v141_v34  ;;  %v233_v36 = vpop.f32.mrb[1].mxu0 }
 0x14f   :  { %164 = vst [vmem:[#allocation9] sm:$0xff] %v163_v35 }
 0x150   :  { %350 = shalt.err (!%p347_p0)
}
 0x151   :  { %s351_s25 = scalar_lea.hbm %s448_s3, 128 }
 0x152   :  { %p352_p1 = scmp.ne.s32.totalorder %s448_s3, %s351_s25  ;;  %p355_p2 = scmp.lt.u32.totalorder %s351_s25, %s448_s3 }
 0x154   :  { %p357_p3 = pnand %p355_p2, %p352_p1 }
 0x156   :  { %360 = shalt.err (!%p357_p3)
}
 0x157   :  { %174 = dma.vmem_to_hbm [thread:$0]  %s172_s21, 128, %s448_s3, [#allocation5]  }
 0x158   :  { %365 = dma.done.wait [#allocation5], 128  }
 0x159   :  { %366 = vsyncadd [#allocation5], 4294967168 }
 0x15a   :  { %178 = vsyncpa [#allocation4], 1 }
 0x15b   :  { %179 = vsyncpa [#allocation7], 1 }
 0x15c   :  { %180 = vsyncpa [#allocation5], 1 }

</bundles_post_ra>
